<compile_context>
chip_gen: v5e
topology: v5e:2x2
jax: 0.10.0
libtpu: 0.0.40
codegen_flags: <defaults>
</compile_context>

<pallas_src>
import functools

import jax
import jax.numpy as jnp
from jax.experimental import pallas as pl
from jax.experimental.pallas import tpu as pltpu


def _lstm_kernel(x_ref, wih_ref, whh_ref, b_ref, hT_ref, *, seq_len, batch, hidden):
    T, B, H = seq_len, batch, hidden

    # One-shot input projection for all timesteps: (T*B, I) @ (I, 4H) + fused bias.
    # Gate order (after wrapper-side permutation) is [i, f, o, g].
    x_proj = (jnp.dot(x_ref[...], wih_ref[...], preferred_element_type=jnp.float32)
              + b_ref[...])                                    # (T*B, 4H)

    whh = whh_ref[...]                                         # (H, 4H), hoisted load

    h = jnp.zeros((B, H), jnp.float32)
    c = jnp.zeros((B, H), jnp.float32)

    # Fully-unrolled time recurrence (T is static); h/c stay in vregs across steps.
    for t in range(T):
        gates = (x_proj[t * B:(t + 1) * B, :]
                 + jnp.dot(h, whh, preferred_element_type=jnp.float32))   # (B, 4H)
        sig = jax.nn.sigmoid(gates[:, :3 * H])   # one wide EUP pass over [i | f | o]
        g_g = jnp.tanh(gates[:, 3 * H:])         # one tanh pass over [g]
        i_g = sig[:, 0 * H:1 * H]
        f_g = sig[:, 1 * H:2 * H]
        o_g = sig[:, 2 * H:3 * H]
        c = f_g * c + i_g * g_g
        h = o_g * jnp.tanh(c)

    hT_ref[...] = h


def lstm_model_forward(x_btI, w_ih, w_hh, b_ih, b_hh, w_fc, b_fc):
    """x_btI: (B, T, I) float32, matching PyTorch batch_first input. Returns (B, O)."""
    B, T, I = x_btI.shape
    H = w_ih.shape[0] // 4
    O = w_fc.shape[0]

    # Pad batch up to a multiple of 8 sublanes (padded rows are discarded later).
    Bp = ((B + 7) // 8) * 8
    x = x_btI.astype(jnp.float32)
    if Bp != B:
        x = jnp.pad(x, ((0, Bp - B), (0, 0), (0, 0)))

    # Time-major, flattened to (T*Bp, I) so the input projection is one matmul.
    x_tb = jnp.transpose(x, (1, 0, 2)).reshape(T * Bp, I)

    # Permute gate blocks [i, f, g, o] -> [i, f, o, g] (one-time, free layout change).
    perm = jnp.concatenate([
        jnp.arange(0, H), jnp.arange(H, 2 * H),
        jnp.arange(3 * H, 4 * H), jnp.arange(2 * H, 3 * H)])
    wih_t = jnp.transpose(w_ih.astype(jnp.float32))[:, perm]          # (I, 4H)
    whh_t = jnp.transpose(w_hh.astype(jnp.float32))[:, perm]          # (H, 4H)
    b = (b_ih + b_hh).astype(jnp.float32)[perm].reshape(1, 4 * H)     # (1, 4H)

    kernel = functools.partial(_lstm_kernel, seq_len=T, batch=Bp, hidden=H)

    h_T = pl.pallas_call(
        kernel,
        out_shape=jax.ShapeDtypeStruct((Bp, H), jnp.float32),
        grid=(1,),
        in_specs=[
            pl.BlockSpec((T * Bp, I), lambda i: (0, 0)),     # x, whole sequence
            pl.BlockSpec((I, 4 * H), lambda i: (0, 0)),      # W_ih^T (permuted)
            pl.BlockSpec((H, 4 * H), lambda i: (0, 0)),      # W_hh^T (permuted)
            pl.BlockSpec((1, 4 * H), lambda i: (0, 0)),      # b_ih + b_hh (permuted)
        ],
        out_specs=pl.BlockSpec((Bp, H), lambda i: (0, 0)),
        compiler_params=pltpu.CompilerParams(
            dimension_semantics=("arbitrary",)),
    )(x_tb, wih_t, whh_t, b)

    h_T = h_T[:B]                                            # drop padded batch rows

    # Dropout(p=0.4) is identity in eval mode; FC head (O=1, lane-width-1 output)
    # runs as plain XLA per the performance review.
    return h_T @ jnp.transpose(w_fc.astype(jnp.float32)) + b_fc.astype(jnp.float32)


def _reference_forward(x, w_ih, w_hh, b_ih, b_hh, w_fc, b_fc):
    """Pure-JAX reference matching torch.nn.LSTM + Linear (eval mode)."""
    B, T, I = x.shape
    H = w_hh.shape[1]
    h = jnp.zeros((B, H), jnp.float32)
    c = jnp.zeros((B, H), jnp.float32)
    for t in range(T):
        gates = x[:, t, :] @ w_ih.T + b_ih + h @ w_hh.T + b_hh
        i = jax.nn.sigmoid(gates[:, 0 * H:1 * H])
        f = jax.nn.sigmoid(gates[:, 1 * H:2 * H])
        g = jnp.tanh(gates[:, 2 * H:3 * H])
        o = jax.nn.sigmoid(gates[:, 3 * H:4 * H])
        c = f * c + i * g
        h = o * jnp.tanh(c)
    return h @ w_fc.T + b_fc


if __name__ == "__main__":
    # Module hyperparameters (from NVDAmodel.py)
    input_size = 1
    hidden_size = 64
    output_size = 1
    # Small example shapes
    batch = 4
    seq_len = 8

    key = jax.random.PRNGKey(0)
    ks = jax.random.split(key, 7)
    scale = 1.0 / jnp.sqrt(hidden_size)

    x = jax.random.normal(ks[0], (batch, seq_len, input_size), jnp.float32)
    w_ih = jax.random.uniform(ks[1], (4 * hidden_size, input_size), jnp.float32, -scale, scale)
    w_hh = jax.random.uniform(ks[2], (4 * hidden_size, hidden_size), jnp.float32, -scale, scale)
    b_ih = jax.random.uniform(ks[3], (4 * hidden_size,), jnp.float32, -scale, scale)
    b_hh = jax.random.uniform(ks[4], (4 * hidden_size,), jnp.float32, -scale, scale)
    w_fc = jax.random.uniform(ks[5], (output_size, hidden_size), jnp.float32, -scale, scale)
    b_fc = jax.random.uniform(ks[6], (output_size,), jnp.float32, -scale, scale)

    out = lstm_model_forward(x, w_ih, w_hh, b_ih, b_hh, w_fc, b_fc)
    out = jax.block_until_ready(out)

    ref = _reference_forward(x, w_ih, w_hh, b_ih, b_hh, w_fc, b_fc)
    assert out.shape == (batch, output_size)
    assert jnp.allclose(out, ref, atol=1e-5, rtol=1e-5), (out, ref)

    print("KERNEL_OK")
</pallas_src>

<mosaic_0001>
module attributes {stable_mosaic.version = 11 : i64} {
  func.func @_lstm_kernel(%arg0: i32, %arg1: memref<64x1xf32, #tpu.memory_space<vmem>>, %arg2: memref<1x256xf32, #tpu.memory_space<vmem>>, %arg3: memref<64x256xf32, #tpu.memory_space<vmem>>, %arg4: memref<1x256xf32, #tpu.memory_space<vmem>>, %arg5: memref<8x64xf32, #tpu.memory_space<vmem>>) attributes {dimension_semantics = [#tpu.dimension_semantics<arbitrary>], iteration_bounds = array<i64: 1>, scalar_prefetch = 0 : i64, scratch_operands = 0 : i64, tpu.core_type = #tpu.core_type<tc>, window_params = [{pipeline_mode = #tpu.pipeline_mode<synchronous>, transform_indices = @transform_0, window_bounds = array<i64: 64, 1>}, {pipeline_mode = #tpu.pipeline_mode<synchronous>, transform_indices = @transform_1, window_bounds = array<i64: 1, 256>}, {pipeline_mode = #tpu.pipeline_mode<synchronous>, transform_indices = @transform_2, window_bounds = array<i64: 64, 256>}, {pipeline_mode = #tpu.pipeline_mode<synchronous>, transform_indices = @transform_3, window_bounds = array<i64: 1, 256>}, {pipeline_mode = #tpu.pipeline_mode<synchronous>, transform_indices = @transform_4, window_bounds = array<i64: 8, 64>}]} {
    %c0 = arith.constant 0 : index
    %c0_0 = arith.constant 0 : index
    %0 = vector.load %arg1[%c0, %c0_0] : memref<64x1xf32, #tpu.memory_space<vmem>>, vector<64x1xf32>
    %c0_1 = arith.constant 0 : index
    %c0_2 = arith.constant 0 : index
    %1 = vector.load %arg2[%c0_1, %c0_2] : memref<1x256xf32, #tpu.memory_space<vmem>>, vector<1x256xf32>
    %cst = arith.constant dense<0.000000e+00> : vector<64x256xf32>
    %2 = tpu.matmul %0, %1, %cst {dimension_numbers = #tpu.dot_dimension_numbers<[1], [0], [0], [1], [0, 0, 1, 1], [], []>} : vector<64x1xf32>, vector<1x256xf32>, vector<64x256xf32> -> vector<64x256xf32>
    %c0_3 = arith.constant 0 : index
    %c0_4 = arith.constant 0 : index
    %3 = vector.load %arg4[%c0_3, %c0_4] : memref<1x256xf32, #tpu.memory_space<vmem>>, vector<1x256xf32>
    %4 = vector.broadcast %3 : vector<1x256xf32> to vector<64x256xf32>
    %5 = arith.addf %2, %4 : vector<64x256xf32>
    %c0_5 = arith.constant 0 : index
    %c0_6 = arith.constant 0 : index
    %6 = vector.load %arg3[%c0_5, %c0_6] : memref<64x256xf32, #tpu.memory_space<vmem>>, vector<64x256xf32>
    %cst_7 = arith.constant 0.000000e+00 : f32
    %7 = vector.broadcast %cst_7 : f32 to vector<8x64xf32>
    %cst_8 = arith.constant 0.000000e+00 : f32
    %8 = vector.broadcast %cst_8 : f32 to vector<8x64xf32>
    %9 = vector.extract_strided_slice %5 {offsets = [0, 0], sizes = [8, 256], strides = [1, 1]} : vector<64x256xf32> to vector<8x256xf32>
    %cst_9 = arith.constant dense<0.000000e+00> : vector<8x256xf32>
    %10 = tpu.matmul %7, %6, %cst_9 {dimension_numbers = #tpu.dot_dimension_numbers<[1], [0], [0], [1], [0, 0, 1, 1], [], []>} : vector<8x64xf32>, vector<64x256xf32>, vector<8x256xf32> -> vector<8x256xf32>
    %11 = arith.addf %9, %10 : vector<8x256xf32>
    %12 = vector.extract_strided_slice %11 {offsets = [0, 0], sizes = [8, 192], strides = [1, 1]} : vector<8x256xf32> to vector<8x192xf32>
    %13 = arith.negf %12 : vector<8x192xf32>
    %14 = math.exp %13 : vector<8x192xf32>
    %cst_10 = arith.constant 1.000000e+00 : f32
    %15 = vector.broadcast %cst_10 : f32 to vector<8x192xf32>
    %16 = arith.addf %15, %14 : vector<8x192xf32>
    %17 = arith.divf %15, %16 : vector<8x192xf32>
    %18 = vector.extract_strided_slice %11 {offsets = [0, 192], sizes = [8, 64], strides = [1, 1]} : vector<8x256xf32> to vector<8x64xf32>
    %19 = math.tanh %18 : vector<8x64xf32>
    %20 = vector.extract_strided_slice %17 {offsets = [0, 0], sizes = [8, 64], strides = [1, 1]} : vector<8x192xf32> to vector<8x64xf32>
    %21 = vector.extract_strided_slice %17 {offsets = [0, 64], sizes = [8, 64], strides = [1, 1]} : vector<8x192xf32> to vector<8x64xf32>
    %22 = vector.extract_strided_slice %17 {offsets = [0, 128], sizes = [8, 64], strides = [1, 1]} : vector<8x192xf32> to vector<8x64xf32>
    %23 = arith.mulf %21, %8 : vector<8x64xf32>
    %24 = arith.mulf %20, %19 : vector<8x64xf32>
    %25 = arith.addf %23, %24 : vector<8x64xf32>
    %26 = math.tanh %25 : vector<8x64xf32>
    %27 = arith.mulf %22, %26 : vector<8x64xf32>
    %28 = vector.extract_strided_slice %5 {offsets = [8, 0], sizes = [8, 256], strides = [1, 1]} : vector<64x256xf32> to vector<8x256xf32>
    %cst_11 = arith.constant dense<0.000000e+00> : vector<8x256xf32>
    %29 = tpu.matmul %27, %6, %cst_11 {dimension_numbers = #tpu.dot_dimension_numbers<[1], [0], [0], [1], [0, 0, 1, 1], [], []>} : vector<8x64xf32>, vector<64x256xf32>, vector<8x256xf32> -> vector<8x256xf32>
    %30 = arith.addf %28, %29 : vector<8x256xf32>
    %31 = vector.extract_strided_slice %30 {offsets = [0, 0], sizes = [8, 192], strides = [1, 1]} : vector<8x256xf32> to vector<8x192xf32>
    %32 = arith.negf %31 : vector<8x192xf32>
    %33 = math.exp %32 : vector<8x192xf32>
    %cst_12 = arith.constant 1.000000e+00 : f32
    %34 = vector.broadcast %cst_12 : f32 to vector<8x192xf32>
    %35 = arith.addf %34, %33 : vector<8x192xf32>
    %36 = arith.divf %34, %35 : vector<8x192xf32>
    %37 = vector.extract_strided_slice %30 {offsets = [0, 192], sizes = [8, 64], strides = [1, 1]} : vector<8x256xf32> to vector<8x64xf32>
    %38 = math.tanh %37 : vector<8x64xf32>
    %39 = vector.extract_strided_slice %36 {offsets = [0, 0], sizes = [8, 64], strides = [1, 1]} : vector<8x192xf32> to vector<8x64xf32>
    %40 = vector.extract_strided_slice %36 {offsets = [0, 64], sizes = [8, 64], strides = [1, 1]} : vector<8x192xf32> to vector<8x64xf32>
    %41 = vector.extract_strided_slice %36 {offsets = [0, 128], sizes = [8, 64], strides = [1, 1]} : vector<8x192xf32> to vector<8x64xf32>
    %42 = arith.mulf %40, %25 : vector<8x64xf32>
    %43 = arith.mulf %39, %38 : vector<8x64xf32>
    %44 = arith.addf %42, %43 : vector<8x64xf32>
    %45 = math.tanh %44 : vector<8x64xf32>
    %46 = arith.mulf %41, %45 : vector<8x64xf32>
    %47 = vector.extract_strided_slice %5 {offsets = [16, 0], sizes = [8, 256], strides = [1, 1]} : vector<64x256xf32> to vector<8x256xf32>
    %cst_13 = arith.constant dense<0.000000e+00> : vector<8x256xf32>
    %48 = tpu.matmul %46, %6, %cst_13 {dimension_numbers = #tpu.dot_dimension_numbers<[1], [0], [0], [1], [0, 0, 1, 1], [], []>} : vector<8x64xf32>, vector<64x256xf32>, vector<8x256xf32> -> vector<8x256xf32>
    %49 = arith.addf %47, %48 : vector<8x256xf32>
    %50 = vector.extract_strided_slice %49 {offsets = [0, 0], sizes = [8, 192], strides = [1, 1]} : vector<8x256xf32> to vector<8x192xf32>
    %51 = arith.negf %50 : vector<8x192xf32>
    %52 = math.exp %51 : vector<8x192xf32>
    %cst_14 = arith.constant 1.000000e+00 : f32
    %53 = vector.broadcast %cst_14 : f32 to vector<8x192xf32>
    %54 = arith.addf %53, %52 : vector<8x192xf32>
    %55 = arith.divf %53, %54 : vector<8x192xf32>
    %56 = vector.extract_strided_slice %49 {offsets = [0, 192], sizes = [8, 64], strides = [1, 1]} : vector<8x256xf32> to vector<8x64xf32>
    %57 = math.tanh %56 : vector<8x64xf32>
    %58 = vector.extract_strided_slice %55 {offsets = [0, 0], sizes = [8, 64], strides = [1, 1]} : vector<8x192xf32> to vector<8x64xf32>
    %59 = vector.extract_strided_slice %55 {offsets = [0, 64], sizes = [8, 64], strides = [1, 1]} : vector<8x192xf32> to vector<8x64xf32>
    %60 = vector.extract_strided_slice %55 {offsets = [0, 128], sizes = [8, 64], strides = [1, 1]} : vector<8x192xf32> to vector<8x64xf32>
    %61 = arith.mulf %59, %44 : vector<8x64xf32>
    %62 = arith.mulf %58, %57 : vector<8x64xf32>
    %63 = arith.addf %61, %62 : vector<8x64xf32>
    %64 = math.tanh %63 : vector<8x64xf32>
    %65 = arith.mulf %60, %64 : vector<8x64xf32>
    %66 = vector.extract_strided_slice %5 {offsets = [24, 0], sizes = [8, 256], strides = [1, 1]} : vector<64x256xf32> to vector<8x256xf32>
    %cst_15 = arith.constant dense<0.000000e+00> : vector<8x256xf32>
    %67 = tpu.matmul %65, %6, %cst_15 {dimension_numbers = #tpu.dot_dimension_numbers<[1], [0], [0], [1], [0, 0, 1, 1], [], []>} : vector<8x64xf32>, vector<64x256xf32>, vector<8x256xf32> -> vector<8x256xf32>
    %68 = arith.addf %66, %67 : vector<8x256xf32>
    %69 = vector.extract_strided_slice %68 {offsets = [0, 0], sizes = [8, 192], strides = [1, 1]} : vector<8x256xf32> to vector<8x192xf32>
    %70 = arith.negf %69 : vector<8x192xf32>
    %71 = math.exp %70 : vector<8x192xf32>
    %cst_16 = arith.constant 1.000000e+00 : f32
    %72 = vector.broadcast %cst_16 : f32 to vector<8x192xf32>
    %73 = arith.addf %72, %71 : vector<8x192xf32>
    %74 = arith.divf %72, %73 : vector<8x192xf32>
    %75 = vector.extract_strided_slice %68 {offsets = [0, 192], sizes = [8, 64], strides = [1, 1]} : vector<8x256xf32> to vector<8x64xf32>
    %76 = math.tanh %75 : vector<8x64xf32>
    %77 = vector.extract_strided_slice %74 {offsets = [0, 0], sizes = [8, 64], strides = [1, 1]} : vector<8x192xf32> to vector<8x64xf32>
    %78 = vector.extract_strided_slice %74 {offsets = [0, 64], sizes = [8, 64], strides = [1, 1]} : vector<8x192xf32> to vector<8x64xf32>
    %79 = vector.extract_strided_slice %74 {offsets = [0, 128], sizes = [8, 64], strides = [1, 1]} : vector<8x192xf32> to vector<8x64xf32>
    %80 = arith.mulf %78, %63 : vector<8x64xf32>
    %81 = arith.mulf %77, %76 : vector<8x64xf32>
    %82 = arith.addf %80, %81 : vector<8x64xf32>
    %83 = math.tanh %82 : vector<8x64xf32>
    %84 = arith.mulf %79, %83 : vector<8x64xf32>
    %85 = vector.extract_strided_slice %5 {offsets = [32, 0], sizes = [8, 256], strides = [1, 1]} : vector<64x256xf32> to vector<8x256xf32>
    %cst_17 = arith.constant dense<0.000000e+00> : vector<8x256xf32>
    %86 = tpu.matmul %84, %6, %cst_17 {dimension_numbers = #tpu.dot_dimension_numbers<[1], [0], [0], [1], [0, 0, 1, 1], [], []>} : vector<8x64xf32>, vector<64x256xf32>, vector<8x256xf32> -> vector<8x256xf32>
    %87 = arith.addf %85, %86 : vector<8x256xf32>
    %88 = vector.extract_strided_slice %87 {offsets = [0, 0], sizes = [8, 192], strides = [1, 1]} : vector<8x256xf32> to vector<8x192xf32>
    %89 = arith.negf %88 : vector<8x192xf32>
    %90 = math.exp %89 : vector<8x192xf32>
    %cst_18 = arith.constant 1.000000e+00 : f32
    %91 = vector.broadcast %cst_18 : f32 to vector<8x192xf32>
    %92 = arith.addf %91, %90 : vector<8x192xf32>
    %93 = arith.divf %91, %92 : vector<8x192xf32>
    %94 = vector.extract_strided_slice %87 {offsets = [0, 192], sizes = [8, 64], strides = [1, 1]} : vector<8x256xf32> to vector<8x64xf32>
    %95 = math.tanh %94 : vector<8x64xf32>
    %96 = vector.extract_strided_slice %93 {offsets = [0, 0], sizes = [8, 64], strides = [1, 1]} : vector<8x192xf32> to vector<8x64xf32>
    %97 = vector.extract_strided_slice %93 {offsets = [0, 64], sizes = [8, 64], strides = [1, 1]} : vector<8x192xf32> to vector<8x64xf32>
    %98 = vector.extract_strided_slice %93 {offsets = [0, 128], sizes = [8, 64], strides = [1, 1]} : vector<8x192xf32> to vector<8x64xf32>
    %99 = arith.mulf %97, %82 : vector<8x64xf32>
    %100 = arith.mulf %96, %95 : vector<8x64xf32>
    %101 = arith.addf %99, %100 : vector<8x64xf32>
    %102 = math.tanh %101 : vector<8x64xf32>
    %103 = arith.mulf %98, %102 : vector<8x64xf32>
    %104 = vector.extract_strided_slice %5 {offsets = [40, 0], sizes = [8, 256], strides = [1, 1]} : vector<64x256xf32> to vector<8x256xf32>
    %cst_19 = arith.constant dense<0.000000e+00> : vector<8x256xf32>
    %105 = tpu.matmul %103, %6, %cst_19 {dimension_numbers = #tpu.dot_dimension_numbers<[1], [0], [0], [1], [0, 0, 1, 1], [], []>} : vector<8x64xf32>, vector<64x256xf32>, vector<8x256xf32> -> vector<8x256xf32>
    %106 = arith.addf %104, %105 : vector<8x256xf32>
    %107 = vector.extract_strided_slice %106 {offsets = [0, 0], sizes = [8, 192], strides = [1, 1]} : vector<8x256xf32> to vector<8x192xf32>
    %108 = arith.negf %107 : vector<8x192xf32>
    %109 = math.exp %108 : vector<8x192xf32>
    %cst_20 = arith.constant 1.000000e+00 : f32
    %110 = vector.broadcast %cst_20 : f32 to vector<8x192xf32>
    %111 = arith.addf %110, %109 : vector<8x192xf32>
    %112 = arith.divf %110, %111 : vector<8x192xf32>
    %113 = vector.extract_strided_slice %106 {offsets = [0, 192], sizes = [8, 64], strides = [1, 1]} : vector<8x256xf32> to vector<8x64xf32>
    %114 = math.tanh %113 : vector<8x64xf32>
    %115 = vector.extract_strided_slice %112 {offsets = [0, 0], sizes = [8, 64], strides = [1, 1]} : vector<8x192xf32> to vector<8x64xf32>
    %116 = vector.extract_strided_slice %112 {offsets = [0, 64], sizes = [8, 64], strides = [1, 1]} : vector<8x192xf32> to vector<8x64xf32>
    %117 = vector.extract_strided_slice %112 {offsets = [0, 128], sizes = [8, 64], strides = [1, 1]} : vector<8x192xf32> to vector<8x64xf32>
    %118 = arith.mulf %116, %101 : vector<8x64xf32>
    %119 = arith.mulf %115, %114 : vector<8x64xf32>
    %120 = arith.addf %118, %119 : vector<8x64xf32>
    %121 = math.tanh %120 : vector<8x64xf32>
    %122 = arith.mulf %117, %121 : vector<8x64xf32>
    %123 = vector.extract_strided_slice %5 {offsets = [48, 0], sizes = [8, 256], strides = [1, 1]} : vector<64x256xf32> to vector<8x256xf32>
    %cst_21 = arith.constant dense<0.000000e+00> : vector<8x256xf32>
    %124 = tpu.matmul %122, %6, %cst_21 {dimension_numbers = #tpu.dot_dimension_numbers<[1], [0], [0], [1], [0, 0, 1, 1], [], []>} : vector<8x64xf32>, vector<64x256xf32>, vector<8x256xf32> -> vector<8x256xf32>
    %125 = arith.addf %123, %124 : vector<8x256xf32>
    %126 = vector.extract_strided_slice %125 {offsets = [0, 0], sizes = [8, 192], strides = [1, 1]} : vector<8x256xf32> to vector<8x192xf32>
    %127 = arith.negf %126 : vector<8x192xf32>
    %128 = math.exp %127 : vector<8x192xf32>
    %cst_22 = arith.constant 1.000000e+00 : f32
    %129 = vector.broadcast %cst_22 : f32 to vector<8x192xf32>
    %130 = arith.addf %129, %128 : vector<8x192xf32>
    %131 = arith.divf %129, %130 : vector<8x192xf32>
    %132 = vector.extract_strided_slice %125 {offsets = [0, 192], sizes = [8, 64], strides = [1, 1]} : vector<8x256xf32> to vector<8x64xf32>
    %133 = math.tanh %132 : vector<8x64xf32>
    %134 = vector.extract_strided_slice %131 {offsets = [0, 0], sizes = [8, 64], strides = [1, 1]} : vector<8x192xf32> to vector<8x64xf32>
    %135 = vector.extract_strided_slice %131 {offsets = [0, 64], sizes = [8, 64], strides = [1, 1]} : vector<8x192xf32> to vector<8x64xf32>
    %136 = vector.extract_strided_slice %131 {offsets = [0, 128], sizes = [8, 64], strides = [1, 1]} : vector<8x192xf32> to vector<8x64xf32>
    %137 = arith.mulf %135, %120 : vector<8x64xf32>
    %138 = arith.mulf %134, %133 : vector<8x64xf32>
    %139 = arith.addf %137, %138 : vector<8x64xf32>
    %140 = math.tanh %139 : vector<8x64xf32>
    %141 = arith.mulf %136, %140 : vector<8x64xf32>
    %142 = vector.extract_strided_slice %5 {offsets = [56, 0], sizes = [8, 256], strides = [1, 1]} : vector<64x256xf32> to vector<8x256xf32>
    %cst_23 = arith.constant dense<0.000000e+00> : vector<8x256xf32>
    %143 = tpu.matmul %141, %6, %cst_23 {dimension_numbers = #tpu.dot_dimension_numbers<[1], [0], [0], [1], [0, 0, 1, 1], [], []>} : vector<8x64xf32>, vector<64x256xf32>, vector<8x256xf32> -> vector<8x256xf32>
    %144 = arith.addf %142, %143 : vector<8x256xf32>
    %145 = vector.extract_strided_slice %144 {offsets = [0, 0], sizes = [8, 192], strides = [1, 1]} : vector<8x256xf32> to vector<8x192xf32>
    %146 = arith.negf %145 : vector<8x192xf32>
    %147 = math.exp %146 : vector<8x192xf32>
    %cst_24 = arith.constant 1.000000e+00 : f32
    %148 = vector.broadcast %cst_24 : f32 to vector<8x192xf32>
    %149 = arith.addf %148, %147 : vector<8x192xf32>
    %150 = arith.divf %148, %149 : vector<8x192xf32>
    %151 = vector.extract_strided_slice %144 {offsets = [0, 192], sizes = [8, 64], strides = [1, 1]} : vector<8x256xf32> to vector<8x64xf32>
    %152 = math.tanh %151 : vector<8x64xf32>
    %153 = vector.extract_strided_slice %150 {offsets = [0, 0], sizes = [8, 64], strides = [1, 1]} : vector<8x192xf32> to vector<8x64xf32>
    %154 = vector.extract_strided_slice %150 {offsets = [0, 64], sizes = [8, 64], strides = [1, 1]} : vector<8x192xf32> to vector<8x64xf32>
    %155 = vector.extract_strided_slice %150 {offsets = [0, 128], sizes = [8, 64], strides = [1, 1]} : vector<8x192xf32> to vector<8x64xf32>
    %156 = arith.mulf %154, %139 : vector<8x64xf32>
    %157 = arith.mulf %153, %152 : vector<8x64xf32>
    %158 = arith.addf %156, %157 : vector<8x64xf32>
    %159 = math.tanh %158 : vector<8x64xf32>
    %160 = arith.mulf %155, %159 : vector<8x64xf32>
    %c0_25 = arith.constant 0 : index
    %c0_26 = arith.constant 0 : index
    %161 = vector.load %arg5[%c0_25, %c0_26] : memref<8x64xf32, #tpu.memory_space<vmem>>, vector<8x64xf32>
    tpu.vector_store %arg5[%c0_25, %c0_26], %160 {strides = array<i32>} : memref<8x64xf32, #tpu.memory_space<vmem>>, vector<8x64xf32>,
    return
  }
  func.func @transform_0(%arg0: i32) -> (i32, i32) {
    %c0_i32 = arith.constant 0 : i32
    %c0_i32_0 = arith.constant 0 : i32
    %c0_i32_1 = arith.constant 0 : i32
    return %c0_i32, %c0_i32_0 : i32, i32
  }
  func.func @transform_1(%arg0: i32) -> (i32, i32) {
    %c0_i32 = arith.constant 0 : i32
    %c0_i32_0 = arith.constant 0 : i32
    %c0_i32_1 = arith.constant 0 : i32
    return %c0_i32, %c0_i32_0 : i32, i32
  }
  func.func @transform_2(%arg0: i32) -> (i32, i32) {
    %c0_i32 = arith.constant 0 : i32
    %c0_i32_0 = arith.constant 0 : i32
    %c0_i32_1 = arith.constant 0 : i32
    return %c0_i32, %c0_i32_0 : i32, i32
  }
  func.func @transform_3(%arg0: i32) -> (i32, i32) {
    %c0_i32 = arith.constant 0 : i32
    %c0_i32_0 = arith.constant 0 : i32
    %c0_i32_1 = arith.constant 0 : i32
    return %c0_i32, %c0_i32_0 : i32, i32
  }
  func.func @transform_4(%arg0: i32) -> (i32, i32) {
    %c0_i32 = arith.constant 0 : i32
    %c0_i32_0 = arith.constant 0 : i32
    %c0_i32_1 = arith.constant 0 : i32
    return %c0_i32, %c0_i32_0 : i32, i32
  }
}

</mosaic_0001>

<bundles_post_ra>
// kernel: tpu_custom_call.1
= control target key start
LH: loop header
LB: loop body
LE: loop exit
PB: predicated region body
PF: predicated region fallthrough
CT: control target
= control target key end

     0   :  { %9 = vsyncpa [#allocation3], 0  ;;  %s1547_s0 = inlined_call_operand.vmem [shape: f32[64,1], index: 0, kind: input, shape index: {}]   ;;  %s1548_s1 = inlined_call_operand.vmem [shape: f32[1,256], index: 1, kind: input, shape index: {}]   ;;  %s1549_s2 = inlined_call_operand.hbm [shape: f32[64,256], index: 2, kind: input, shape index: {}]   ;;  %s1550_s3 = inlined_call_operand.vmem [shape: f32[1,256], index: 3, kind: input, shape index: {}]   ;;  %s1551_s4 = inlined_call_operand.hbm [shape: f32[8,64], index: 4, kind: output, shape index: {}]  }
   0x1   :  { %10 = vsyncpa [#allocation4], 0  ;;  %s19_s17 = sshll.u32 %s1549_s2, 4  ;;  %s1209_s18 = smov [#allocation2]   ;;  %s20_s17 = int_to_ptr.hbm [resolvable:$true] %s19_s17 }
   0x2   :  { %s21_s19 = sshll.u32 %s1209_s18, 4  ;;  %s1210_s20 = smov 256   ;;  %s22_s19 = int_to_ptr.vmem [resolvable:$true] %s21_s19 }
   0x3   :  { %s1211_s21 = smov 16  }
   0x4   :  { %27 = dma.hbm_to_vmem [thread:$0]  %s20_s17, 2048, %s22_s19, [#allocation3], %s1210_s20, %s1210_s20, %s1211_s21  }
   0x5   :  { %1205 = dma.done.wait [#allocation3], 2048  }
   0x6   :  { %1206 = vsyncadd [#allocation3], 4294965248  ;;  %v1243_v0 = vld [vmem:[#allocation2 + $0x78] sm:$0xff]  ;;  %v1245_v1 = vld [vmem:[#allocation2 + $0x68] sm:$0xff]  ;;  %vm77_vm0 = vcmask 1040384   ;;  %vm52_vm1 = vcmask 7168  }
   0x7   :  { %212 = vmatpush.msra.mxu3 %v1243_v0  ;;  %v1248_v2 = vld [vmem:[#allocation2 + $0x58] sm:$0xff]  ;;  %v42_v3 = vld [vmem:[%s1548_s1] sm:$0x3]  ;;  %v1257_v6 = vld [vmem:[#allocation2 + $0x70] sm:$0xff]  ;;  %v1212_v20 = vmov 0.0   ;;  %s1213_s26 = smov 64  }
   0x8   :  { %v51_v4 = vperm.slane %v42_v3, 1  ;;  %v34_v5 = vld [vmem:[%s1547_s0] sm:$0xff]  ;;  %v50_v8 = vperm.slane %v42_v3, 0  ;;  %v1261_v9 = vld [vmem:[#allocation2 + $0x48] sm:$0xff]  ;;  %192 = vmatpush.msra.mxu2 %v1257_v6  ;;  %v1266_v10 = vld [vmem:[#allocation2 + $0x50] sm:$0xff]  ;;  %vm180_vm10 = vcmask 523264  }
   0x9   :  { %213 = vmatpush.msra.mxu3 %v1245_v1  ;;  %v1259_v7 = vld [vmem:[#allocation2 + $0x60] sm:$0xff]  ;;  %v1268_v11 = vld [vmem:[#allocation2 + $0x38] sm:$0xff]  ;;  %v1276_v13 = vld [vmem:[#allocation2 + $0x28] sm:$0xff]  ;;  %s997_s17 = sshll.u32 %s1551_s4, 4  ;;  %s998_s17 = int_to_ptr.hbm [resolvable:$true] %s997_s17 }
   0xa   :  { %1016 = vmatpush.msk.msra.mxu1 %vm77_vm0, %v51_v4  ;;  %193 = vmatpush.msra.mxu2 %v1259_v7  ;;  %v1273_v12 = vld [vmem:[#allocation2 + $0x40] sm:$0xff]  ;;  %v1281_v14 = vld [vmem:[#allocation2 + $0x30] sm:$0xff]  ;;  %v1284_v15 = vld [vmem:[#allocation2 + $0x18] sm:$0xff] }
   0xb   :  { %214 = vmatpush.msra.mxu3 %v1248_v2  ;;  %1017 = vmatmul.msk.f32.vlgmr.msra.gmra.mxu1 %vm52_vm1, %v34_v5  ;;  %v1289_v16 = vld [vmem:[#allocation2 + $0x20] sm:$0xff]  ;;  %v1292_v17 = vld [vmem:[#allocation2 + $0x8] sm:$0xff]  ;;  %v1297_v18 = vld [vmem:[#allocation2 + $0x10] sm:$0xff] }
   0xc   :  { %1007 = vmatpush.msk.msra.mxu0 %vm77_vm0, %v50_v8  ;;  %194 = vmatpush.msra.mxu2 %v1266_v10  ;;  %v1303_v19 = vld [vmem:[#allocation2] sm:$0xff]  ;;  %v35_v55 = vld [vmem:[%s1547_s0 + $0x8] sm:$0xff] }
   0xd   :  { %215 = vmatpush.msra.mxu3 %v1261_v9  ;;  %1008 = vmatmul.msk.f32.vlgmr.msra.gmra.mxu0 %vm52_vm1, %v34_v5  ;;  %v43_v21 = vld [vmem:[%s1550_s3] sm:$0x3] }
   0xe   :  { %616 = vmatpush.msrb.mxu1 %v1243_v0  ;;  %195 = vmatpush.msra.mxu2 %v1273_v12  ;;  %v1368_v22 = vperm.slane %v43_v21, 1  ;;  %v1372_v28 = vperm.slane %v43_v21, 0 }
   0xf   :  { %216 = vmatpush.msra.mxu3 %v1268_v11  ;;  %596 = vmatpush.msrb.mxu0 %v1257_v6 }
  0x10   :  { %617 = vmatpush.msrb.mxu1 %v1245_v1  ;;  %196 = vmatpush.msra.mxu2 %v1281_v14 }
  0x11   :  { %217 = vmatpush.msra.mxu3 %v1276_v13  ;;  %597 = vmatpush.msrb.mxu0 %v1259_v7 }
  0x12   :  { %618 = vmatpush.msrb.mxu1 %v1248_v2  ;;  %197 = vmatpush.msra.mxu2 %v1289_v16 }
  0x13   :  { %218 = vmatpush.msra.mxu3 %v1284_v15  ;;  %598 = vmatpush.msrb.mxu0 %v1266_v10 }
  0x14   :  { %619 = vmatpush.msrb.mxu1 %v1261_v9  ;;  %198 = vmatpush.msra.mxu2 %v1297_v18 }
  0x15   :  { %219 = vmatpush.msra.mxu3 %v1292_v17  ;;  %599 = vmatpush.msrb.mxu0 %v1273_v12 }
  0x16   :  { %220 = vmatmul.f32.vlgmr.msra.gmra.mxu3 %v1212_v20  ;;  %620 = vmatpush.msrb.mxu1 %v1268_v11 }
  0x17   :  { %313 = vmatpush.msrb.mxu3 %v1243_v0  ;;  %199 = vmatpush.msra.mxu2 %v1303_v19 }
  0x18   :  { %200 = vmatmul.f32.vlgmr.msra.gmra.mxu2 %v1212_v20  ;;  %621 = vmatpush.msrb.mxu1 %v1276_v13 }
  0x19   :  { %314 = vmatpush.msrb.mxu3 %v1245_v1  ;;  %293 = vmatpush.msrb.mxu2 %v1257_v6 }
  0x1a   :  { %600 = vmatpush.msrb.mxu0 %v1281_v14  ;;  %622 = vmatpush.msrb.mxu1 %v1284_v15 }
  0x1b   :  { %315 = vmatpush.msrb.mxu3 %v1248_v2  ;;  %294 = vmatpush.msrb.mxu2 %v1259_v7 }
  0x1c   :  { %601 = vmatpush.msrb.mxu0 %v1289_v16  ;;  %623 = vmatpush.msrb.mxu1 %v1292_v17 }
  0x1d   :  { %316 = vmatpush.msrb.mxu3 %v1261_v9  ;;  %295 = vmatpush.msrb.mxu2 %v1266_v10 }
  0x1e   :  { %602 = vmatpush.msrb.mxu0 %v1297_v18  ;;  %818 = vmatpush.msra.mxu1 %v1243_v0 }
  0x1f   :  { %317 = vmatpush.msrb.mxu3 %v1268_v11  ;;  %296 = vmatpush.msrb.mxu2 %v1273_v12 }
  0x20   :  { %603 = vmatpush.msrb.mxu0 %v1303_v19  ;;  %819 = vmatpush.msra.mxu1 %v1245_v1 }
  0x21   :  { %318 = vmatpush.msrb.mxu3 %v1276_v13  ;;  %297 = vmatpush.msrb.mxu2 %v1281_v14 }
  0x22   :  { %798 = vmatpush.msra.mxu0 %v1257_v6  ;;  %820 = vmatpush.msra.mxu1 %v1248_v2 }
  0x23   :  { %319 = vmatpush.msrb.mxu3 %v1284_v15  ;;  %298 = vmatpush.msrb.mxu2 %v1289_v16 }
  0x24   :  { %799 = vmatpush.msra.mxu0 %v1259_v7  ;;  %821 = vmatpush.msra.mxu1 %v1261_v9 }
  0x25   :  { %320 = vmatpush.msrb.mxu3 %v1292_v17  ;;  %299 = vmatpush.msrb.mxu2 %v1297_v18 }
  0x26   :  { %800 = vmatpush.msra.mxu0 %v1266_v10  ;;  %822 = vmatpush.msra.mxu1 %v1268_v11 }
  0x27   :  { %414 = vmatpush.msra.mxu3 %v1243_v0  ;;  %300 = vmatpush.msrb.mxu2 %v1303_v19 }
  0x28   :  { %801 = vmatpush.msra.mxu0 %v1273_v12  ;;  %823 = vmatpush.msra.mxu1 %v1276_v13 }
  0x29   :  { %415 = vmatpush.msra.mxu3 %v1245_v1  ;;  %394 = vmatpush.msra.mxu2 %v1257_v6 }
  0x2a   :  { %802 = vmatpush.msra.mxu0 %v1281_v14  ;;  %824 = vmatpush.msra.mxu1 %v1284_v15 }
  0x2b   :  { %416 = vmatpush.msra.mxu3 %v1248_v2  ;;  %395 = vmatpush.msra.mxu2 %v1259_v7 }
  0x2c   :  { %803 = vmatpush.msra.mxu0 %v1289_v16  ;;  %825 = vmatpush.msra.mxu1 %v1292_v17 }
  0x2d   :  { %417 = vmatpush.msra.mxu3 %v1261_v9  ;;  %396 = vmatpush.msra.mxu2 %v1266_v10 }
  0x2e   :  { %804 = vmatpush.msra.mxu0 %v1297_v18  ;;  %1018 = vmatmul.msk.f32.gmra.mxu1 %vm52_vm1, %v35_v55 }
  0x2f   :  { %418 = vmatpush.msra.mxu3 %v1268_v11  ;;  %397 = vmatpush.msra.mxu2 %v1273_v12 }
  0x30   :  { %805 = vmatpush.msra.mxu0 %v1303_v19 }
  0x31   :  { %419 = vmatpush.msra.mxu3 %v1276_v13  ;;  %398 = vmatpush.msra.mxu2 %v1281_v14 }
  0x32   :  { %1009 = vmatmul.msk.f32.gmra.mxu0 %vm52_vm1, %v35_v55 }
  0x33   :  { %420 = vmatpush.msra.mxu3 %v1284_v15  ;;  %399 = vmatpush.msra.mxu2 %v1289_v16 }
  0x35   :  { %421 = vmatpush.msra.mxu3 %v1292_v17  ;;  %400 = vmatpush.msra.mxu2 %v1297_v18 }
  0x37   :  { %401 = vmatpush.msra.mxu2 %v1303_v19 }
  0x88   :  { %v140_v23 = vpop.f32.mrf.mxu1 }
  0x89   :  { %v141_v24 = vadd.f32 %v140_v23, %v1368_v22 }
  0x8a   :  { %v99_v29 = vpop.f32.mrf.mxu0 }
  0x8b   :  { %v100_v30 = vadd.f32 %v99_v29, %v1372_v28 }
  0x99   :  { %v221_v25 = vpop.f32.mrf.mxu3 }
  0x9a   :  { %v225_v26 = vadd.f32 %v221_v25, %v141_v24 }
  0x9b   :  { %v201_v31 = vpop.f32.mrf.mxu2 }
  0x9c   :  { %1061 = vtanh.f32 %v225_v26  ;;  %v224_v32 = vadd.f32 %v201_v31, %v100_v30  ;;  %v1026_v52 = vmul.f32 -1.442695, %v225_v26 }
  0x9e   :  { %v1025_v33 = vmul.f32 -1.442695, %v224_v32 }
  0xa0   :  { %1063 = vpow2.f32 %v1025_v33 }
  0xa2   :  { %v1062_v27 = vpop.eup %1061 }
  0xa3   :  { %267 = vrot.lane.b32.xlu0 %v1062_v27, %s1213_s26 }
  0xa6   :  { %v1064_v34 = vpop.eup %1063 }
  0xa7   :  { %v232_v35 = vadd.f32 1.0, %v1064_v34 }
  0xa9   :  { %1065 = vrcp.f32 %v232_v35  ;;  %vm239_vm2 = vweird.f32 %v232_v35  ;;  %v245_v40 = vand.u32 2147483648, %v232_v35  ;;  %v243_v42 = vand.u32 2147483647, %v232_v35 }
  0xab   :  { %v246_v43 = vor.u32 1.1754944e-38, %v245_v40  ;;  %vm244_vm5 = vcmp.eq.f32.partialorder %v243_v42, 8.507059e+37  ;;  %v143_v20 = vpop.f32.mrf.mxu1 }
  0xac   :  { %v144_v21 = vadd.f32 %v143_v20, %v1368_v22 }
  0xaf   :  { %v1066_v36 = vpop.eup %1065  ;;  %v102_v26 = vpop.f32.mrf.mxu0 }
  0xb0   :  { %v235_v37 = vmul.f32 %v1066_v36, %v232_v35  ;;  %vm240_vm3 = vweird.f32 %v1066_v36  ;;  %v103_v27 = vadd.f32 %v102_v26, %v1372_v28 }
  0xb1   :  { %vm241_vm4 = vmor %vm239_vm2, %vm240_vm3 }
  0xb2   :  { %v236_v38 = vsub.f32 1.0, %v235_v37 }
  0xb4   :  { %v237_v39 = vmul.f32 %v1066_v36, %v236_v38 }
  0xb6   :  { %v238_v41 = vadd.f32 %v1066_v36, %v237_v39 }
  0xb8   :  { %v242_v44 = vsel %vm241_vm4, %v1066_v36, %v238_v41 }
  0xb9   :  { %v247_v46 = vsel %vm244_vm5, %v246_v43, %v242_v44 }
  0xba   :  { %v265_v48 = vmul.f32 0.0, %v247_v46 }
 0x115   :  { %v268_v45 = vpop.permute.xlu0 %267 }
 0x116   :  { %v270_v47 = vmul.f32 %v268_v45, %v247_v46 }
 0x118   :  { %272 = vrot.lane.b32.xlu0 %v270_v47, %s1213_s26 }
 0x18a   :  { %v273_v49 = vpop.permute.xlu0 %272 }
 0x18b   :  { %v1376_v50 = vadd.f32 %v273_v49, %v265_v48 }
 0x18d   :  { %1067 = vtanh.f32 %v1376_v50 }
 0x18e   :  { %1069 = vpow2.f32 %v1026_v52 }
 0x193   :  { %v1068_v51 = vpop.eup %1067 }
 0x194   :  { %278 = vrot.lane.b32.xlu1 %v1068_v51, %s1213_s26  ;;  %v1070_v53 = vpop.eup %1069 }
 0x195   :  { %v233_v54 = vadd.f32 1.0, %v1070_v53 }
 0x197   :  { %1071 = vrcp.f32 %v233_v54  ;;  %v260_v61 = vand.u32 2147483648, %v233_v54  ;;  %vm254_vm7 = vweird.f32 %v233_v54  ;;  %v258_v62 = vand.u32 2147483647, %v233_v54 }
 0x199   :  { %v261_v3 = vor.u32 1.1754944e-38, %v260_v61  ;;  %vm259_vm9 = vcmp.eq.f32.partialorder %v258_v62, 8.507059e+37 }
 0x19d   :  { %v1072_v56 = vpop.eup %1071 }
 0x19e   :  { %v250_v57 = vmul.f32 %v1072_v56, %v233_v54  ;;  %vm255_vm6 = vweird.f32 %v1072_v56  ;;  %v36_v54 = vld [vmem:[%s1547_s0 + $0x10] sm:$0xff] }
 0x19f   :  { %vm256_vm8 = vmor %vm254_vm7, %vm255_vm6  ;;  %1010 = vmatmul.msk.f32.gmra.mxu0 %vm52_vm1, %v36_v54  ;;  %1019 = vmatmul.msk.f32.gmra.mxu1 %vm52_vm1, %v36_v54 }
 0x1a0   :  { %v251_v58 = vsub.f32 1.0, %v250_v57 }
 0x1a2   :  { %v252_v59 = vmul.f32 %v1072_v56, %v251_v58 }
 0x1a4   :  { %v253_v60 = vadd.f32 %v1072_v56, %v252_v59 }
 0x1a6   :  { %v257_v63 = vsel %vm256_vm8, %v1072_v56, %v253_v60 }
 0x1a7   :  { %v262_v4 = vsel %vm259_vm9, %v261_v3, %v257_v63 }
 0x206   :  { %v279_v5 = vpop.permute.xlu1 %278 }
 0x207   :  { %v281_v8 = vmul.f32 %v279_v5, %v262_v4 }
 0x209   :  { %1027 = vmatmul.msk.f32.vlgmr.msrb.gmra.mxu2 %vm180_vm10, %v281_v8  ;;  %1028 = vmatmul.msk.f32.vlgmr.msrb.gmra.mxu3 %vm180_vm10, %v281_v8 }
 0x20a   :  { %495 = vmatpush.msrb.mxu2 %v1257_v6  ;;  %515 = vmatpush.msrb.mxu3 %v1243_v0 }
 0x20c   :  { %496 = vmatpush.msrb.mxu2 %v1259_v7  ;;  %516 = vmatpush.msrb.mxu3 %v1245_v1 }
 0x20e   :  { %497 = vmatpush.msrb.mxu2 %v1266_v10  ;;  %517 = vmatpush.msrb.mxu3 %v1248_v2 }
 0x210   :  { %498 = vmatpush.msrb.mxu2 %v1273_v12  ;;  %518 = vmatpush.msrb.mxu3 %v1261_v9 }
 0x212   :  { %499 = vmatpush.msrb.mxu2 %v1281_v14  ;;  %519 = vmatpush.msrb.mxu3 %v1268_v11 }
 0x214   :  { %500 = vmatpush.msrb.mxu2 %v1289_v16  ;;  %520 = vmatpush.msrb.mxu3 %v1276_v13 }
 0x216   :  { %501 = vmatpush.msrb.mxu2 %v1297_v18  ;;  %521 = vmatpush.msrb.mxu3 %v1284_v15 }
 0x218   :  { %502 = vmatpush.msrb.mxu2 %v1303_v19  ;;  %522 = vmatpush.msrb.mxu3 %v1292_v17 }
 0x21c   :  { %v146_v5 = vpop.f32.mrf.mxu1 }
 0x21d   :  { %v147_v8 = vadd.f32 %v146_v5, %v1368_v22 }
 0x28c   :  { %v322_v23 = vpop.f32.mrf.mxu3  ;;  %v302_v29 = vpop.f32.mrf.mxu2 }
 0x28d   :  { %v326_v24 = vadd.f32 %v322_v23, %v144_v21  ;;  %v325_v30 = vadd.f32 %v302_v29, %v103_v27 }
 0x28f   :  { %1073 = vtanh.f32 %v326_v24  ;;  %v1029_v31 = vmul.f32 -1.442695, %v325_v30  ;;  %v1030_v51 = vmul.f32 -1.442695, %v326_v24  ;;  %v105_v24 = vpop.f32.mrf.mxu0 }
 0x291   :  { %1075 = vpow2.f32 %v1029_v31 }
 0x295   :  { %v1074_v25 = vpop.eup %1073 }
 0x296   :  { %368 = vrot.lane.b32.xlu1 %v1074_v25, %s1213_s26  ;;  %v106_v25 = vadd.f32 %v105_v24, %v1372_v28 }
 0x297   :  { %v1076_v32 = vpop.eup %1075 }
 0x298   :  { %v333_v33 = vadd.f32 1.0, %v1076_v32 }
 0x29a   :  { %1077 = vrcp.f32 %v333_v33  ;;  %v346_v39 = vand.u32 2147483648, %v333_v33  ;;  %vm340_vm12 = vweird.f32 %v333_v33  ;;  %v344_v40 = vand.u32 2147483647, %v333_v33 }
 0x29c   :  { %v347_v42 = vor.u32 1.1754944e-38, %v346_v39  ;;  %vm345_vm14 = vcmp.eq.f32.partialorder %v344_v40, 8.507059e+37 }
 0x2a0   :  { %v1078_v34 = vpop.eup %1077 }
 0x2a1   :  { %v336_v35 = vmul.f32 %v1078_v34, %v333_v33  ;;  %vm341_vm11 = vweird.f32 %v1078_v34 }
 0x2a2   :  { %vm342_vm13 = vmor %vm340_vm12, %vm341_vm11 }
 0x2a3   :  { %v337_v36 = vsub.f32 1.0, %v336_v35 }
 0x2a5   :  { %v338_v37 = vmul.f32 %v1078_v34, %v337_v36 }
 0x2a7   :  { %v339_v38 = vadd.f32 %v1078_v34, %v338_v37 }
 0x2a9   :  { %v343_v41 = vsel %vm342_vm13, %v1078_v34, %v339_v38 }
 0x2aa   :  { %v348_v44 = vsel %vm345_vm14, %v347_v42, %v343_v41 }
 0x2ab   :  { %v366_v46 = vmul.f32 %v348_v44, %v1376_v50 }
 0x308   :  { %v369_v43 = vpop.permute.xlu1 %368 }
 0x309   :  { %v371_v45 = vmul.f32 %v369_v43, %v348_v44 }
 0x30b   :  { %373 = vrot.lane.b32.xlu2 %v371_v45, %s1213_s26 }
 0x365   :  { %v374_v47 = vpop.permute.xlu2 %373 }
 0x366   :  { %v1408_v48 = vadd.f32 %v374_v47, %v366_v46 }
 0x368   :  { %1079 = vtanh.f32 %v1408_v48 }
 0x369   :  { %1081 = vpow2.f32 %v1030_v51 }
 0x36e   :  { %v1080_v49 = vpop.eup %1079 }
 0x36f   :  { %379 = vrot.lane.b32.xlu2 %v1080_v49, %s1213_s26  ;;  %v1082_v52 = vpop.eup %1081 }
 0x370   :  { %v334_v53 = vadd.f32 1.0, %v1082_v52 }
 0x372   :  { %1083 = vrcp.f32 %v334_v53  ;;  %v361_v59 = vand.u32 2147483648, %v334_v53  ;;  %vm355_vm0 = vweird.f32 %v334_v53  ;;  %v359_v60 = vand.u32 2147483647, %v334_v53 }
 0x374   :  { %v362_v62 = vor.u32 1.1754944e-38, %v361_v59  ;;  %vm360_vm3 = vcmp.eq.f32.partialorder %v359_v60, 8.507059e+37 }
 0x378   :  { %v1084_v50 = vpop.eup %1083 }
 0x379   :  { %v351_v55 = vmul.f32 %v1084_v50, %v334_v53  ;;  %vm356_vm15 = vweird.f32 %v1084_v50  ;;  %v37_v53 = vld [vmem:[%s1547_s0 + $0x18] sm:$0xff] }
 0x37a   :  { %vm357_vm2 = vmor %vm355_vm0, %vm356_vm15  ;;  %1011 = vmatmul.msk.f32.gmra.mxu0 %vm52_vm1, %v37_v53  ;;  %1020 = vmatmul.msk.f32.gmra.mxu1 %vm52_vm1, %v37_v53 }
 0x37b   :  { %v352_v56 = vsub.f32 1.0, %v351_v55 }
 0x37d   :  { %v353_v57 = vmul.f32 %v1084_v50, %v352_v56 }
 0x37f   :  { %v354_v58 = vadd.f32 %v1084_v50, %v353_v57 }
 0x381   :  { %v358_v61 = vsel %vm357_vm2, %v1084_v50, %v354_v58 }
 0x382   :  { %v363_v63 = vsel %vm360_vm3, %v362_v62, %v358_v61 }
 0x3c9   :  { %v380_v3 = vpop.permute.xlu2 %379 }
 0x3ca   :  { %v382_v4 = vmul.f32 %v380_v3, %v363_v63 }
 0x3cc   :  { %1031 = vmatmul.msk.f32.vlgmr.msra.gmra.mxu2 %vm180_vm10, %v382_v4  ;;  %1032 = vmatmul.msk.f32.vlgmr.msra.gmra.mxu3 %vm180_vm10, %v382_v4 }
 0x3cd   :  { %697 = vmatpush.msra.mxu2 %v1257_v6  ;;  %717 = vmatpush.msra.mxu3 %v1243_v0 }
 0x3cf   :  { %698 = vmatpush.msra.mxu2 %v1259_v7  ;;  %718 = vmatpush.msra.mxu3 %v1245_v1 }
 0x3d1   :  { %699 = vmatpush.msra.mxu2 %v1266_v10  ;;  %719 = vmatpush.msra.mxu3 %v1248_v2 }
 0x3d3   :  { %700 = vmatpush.msra.mxu2 %v1273_v12  ;;  %720 = vmatpush.msra.mxu3 %v1261_v9 }
 0x3d5   :  { %701 = vmatpush.msra.mxu2 %v1281_v14  ;;  %721 = vmatpush.msra.mxu3 %v1268_v11 }
 0x3d7   :  { %702 = vmatpush.msra.mxu2 %v1289_v16  ;;  %722 = vmatpush.msra.mxu3 %v1276_v13 }
 0x3d9   :  { %703 = vmatpush.msra.mxu2 %v1297_v18  ;;  %723 = vmatpush.msra.mxu3 %v1284_v15 }
 0x3db   :  { %704 = vmatpush.msra.mxu2 %v1303_v19  ;;  %724 = vmatpush.msra.mxu3 %v1292_v17 }
 0x44f   :  { %v423_v20 = vpop.f32.mrf.mxu3  ;;  %v403_v26 = vpop.f32.mrf.mxu2 }
 0x450   :  { %v427_v21 = vadd.f32 %v423_v20, %v147_v8  ;;  %v426_v27 = vadd.f32 %v403_v26, %v106_v25  ;;  %v38_v25 = vld [vmem:[%s1547_s0 + $0x20] sm:$0xff]  ;;  %v39_v26 = vld [vmem:[%s1547_s0 + $0x28] sm:$0xff] }
 0x451   :  { %1012 = vmatmul.msk.f32.gmra.mxu0 %vm52_vm1, %v38_v25  ;;  %1021 = vmatmul.msk.f32.gmra.mxu1 %vm52_vm1, %v38_v25 }
 0x452   :  { %1085 = vtanh.f32 %v427_v21  ;;  %v1033_v29 = vmul.f32 -1.442695, %v426_v27  ;;  %v1034_v49 = vmul.f32 -1.442695, %v427_v21  ;;  %v40_v27 = vld [vmem:[%s1547_s0 + $0x30] sm:$0xff] }
 0x454   :  { %1087 = vpow2.f32 %v1033_v29 }
 0x458   :  { %v1086_v23 = vpop.eup %1085 }
 0x459   :  { %469 = vrot.lane.b32.xlu0 %v1086_v23, %s1213_s26  ;;  %1013 = vmatmul.msk.f32.gmra.mxu0 %vm52_vm1, %v39_v26 }
 0x45a   :  { %v1088_v30 = vpop.eup %1087  ;;  %1022 = vmatmul.msk.f32.gmra.mxu1 %vm52_vm1, %v39_v26 }
 0x45b   :  { %v434_v31 = vadd.f32 1.0, %v1088_v30 }
 0x45d   :  { %1089 = vrcp.f32 %v434_v31  ;;  %v447_v37 = vand.u32 2147483648, %v434_v31  ;;  %vm441_vm5 = vweird.f32 %v434_v31  ;;  %v445_v38 = vand.u32 2147483647, %v434_v31 }
 0x45f   :  { %v448_v40 = vor.u32 1.1754944e-38, %v447_v37  ;;  %vm446_vm7 = vcmp.eq.f32.partialorder %v445_v38, 8.507059e+37 }
 0x461   :  { %1014 = vmatmul.msk.f32.gmra.mxu0 %vm52_vm1, %v40_v27 }
 0x462   :  { %1023 = vmatmul.msk.f32.gmra.mxu1 %vm52_vm1, %v40_v27 }
 0x463   :  { %v1090_v32 = vpop.eup %1089 }
 0x464   :  { %v437_v33 = vmul.f32 %v1090_v32, %v434_v31  ;;  %vm442_vm4 = vweird.f32 %v1090_v32  ;;  %v41_v31 = vld [vmem:[%s1547_s0 + $0x38] sm:$0xff]  ;;  %s1214_s0 = smov [#allocation5]  }
 0x465   :  { %vm443_vm6 = vmor %vm441_vm5, %vm442_vm4  ;;  %s995_s14 = sshll.u32 %s1214_s0, 4  ;;  %s996_s14 = int_to_ptr.vmem [resolvable:$true] %s995_s14 }
 0x466   :  { %v438_v34 = vsub.f32 1.0, %v437_v33 }
 0x468   :  { %v439_v35 = vmul.f32 %v1090_v32, %v438_v34 }
 0x469   :  { %1015 = vmatmul.msk.f32.gmra.mxu0 %vm52_vm1, %v41_v31 }
 0x46a   :  { %v440_v36 = vadd.f32 %v1090_v32, %v439_v35  ;;  %1024 = vmatmul.msk.f32.gmra.mxu1 %vm52_vm1, %v41_v31 }
 0x46c   :  { %v444_v39 = vsel %vm443_vm6, %v1090_v32, %v440_v36 }
 0x46d   :  { %v449_v42 = vsel %vm446_vm7, %v448_v40, %v444_v39 }
 0x46e   :  { %v467_v44 = vmul.f32 %v449_v42, %v1408_v48 }
 0x4cb   :  { %v470_v41 = vpop.permute.xlu0 %469 }
 0x4cc   :  { %v472_v43 = vmul.f32 %v470_v41, %v449_v42 }
 0x4ce   :  { %474 = vrot.lane.b32.xlu1 %v472_v43, %s1213_s26 }
 0x540   :  { %v475_v45 = vpop.permute.xlu1 %474 }
 0x541   :  { %v1440_v46 = vadd.f32 %v475_v45, %v467_v44 }
 0x543   :  { %1091 = vtanh.f32 %v1440_v46 }
 0x544   :  { %1093 = vpow2.f32 %v1034_v49 }
 0x549   :  { %v1092_v47 = vpop.eup %1091 }
 0x54a   :  { %480 = vrot.lane.b32.xlu2 %v1092_v47, %s1213_s26  ;;  %v1094_v51 = vpop.eup %1093 }
 0x54b   :  { %v435_v52 = vadd.f32 1.0, %v1094_v51 }
 0x54d   :  { %1095 = vrcp.f32 %v435_v52  ;;  %v462_v57 = vand.u32 2147483648, %v435_v52  ;;  %vm456_vm9 = vweird.f32 %v435_v52  ;;  %v460_v58 = vand.u32 2147483647, %v435_v52 }
 0x54f   :  { %v463_v60 = vor.u32 1.1754944e-38, %v462_v57  ;;  %vm461_vm12 = vcmp.eq.f32.partialorder %v460_v58, 8.507059e+37 }
 0x553   :  { %v1096_v48 = vpop.eup %1095 }
 0x554   :  { %v452_v54 = vmul.f32 %v1096_v48, %v435_v52  ;;  %vm457_vm8 = vweird.f32 %v1096_v48 }
 0x555   :  { %vm458_vm11 = vmor %vm456_vm9, %vm457_vm8 }
 0x556   :  { %v453_v50 = vsub.f32 1.0, %v452_v54 }
 0x558   :  { %v454_v55 = vmul.f32 %v1096_v48, %v453_v50 }
 0x55a   :  { %v455_v56 = vadd.f32 %v1096_v48, %v454_v55 }
 0x55c   :  { %v459_v59 = vsel %vm458_vm11, %v1096_v48, %v455_v56 }
 0x55d   :  { %v464_v61 = vsel %vm461_vm12, %v463_v60, %v459_v59 }
 0x5a4   :  { %v481_v62 = vpop.permute.xlu2 %480 }
 0x5a5   :  { %v483_v63 = vmul.f32 %v481_v62, %v464_v61 }
 0x5a7   :  { %1035 = vmatmul.msk.f32.vlgmr.msrb.gmra.mxu2 %vm180_vm10, %v483_v63  ;;  %1036 = vmatmul.msk.f32.vlgmr.msrb.gmra.mxu3 %vm180_vm10, %v483_v63 }
 0x5a8   :  { %899 = vmatpush.msrb.mxu2 %v1257_v6  ;;  %919 = vmatpush.msrb.mxu3 %v1243_v0  ;;  %v149_v0 = vpop.f32.mrf.mxu1 }
 0x5aa   :  { %900 = vmatpush.msrb.mxu2 %v1259_v7  ;;  %920 = vmatpush.msrb.mxu3 %v1245_v1  ;;  %v150_v1 = vadd.f32 %v149_v0, %v1368_v22 }
 0x5ac   :  { %901 = vmatpush.msrb.mxu2 %v1266_v10  ;;  %921 = vmatpush.msrb.mxu3 %v1248_v2 }
 0x5ae   :  { %902 = vmatpush.msrb.mxu2 %v1273_v12  ;;  %922 = vmatpush.msrb.mxu3 %v1261_v9  ;;  %v108_v9 = vpop.f32.mrf.mxu0 }
 0x5af   :  { %v109_v10 = vadd.f32 %v108_v9, %v1372_v28 }
 0x5b0   :  { %903 = vmatpush.msrb.mxu2 %v1281_v14  ;;  %923 = vmatpush.msrb.mxu3 %v1268_v11  ;;  %v152_v51 = vpop.f32.mrf.mxu1 }
 0x5b1   :  { %v153_v54 = vadd.f32 %v152_v51, %v1368_v22 }
 0x5b2   :  { %904 = vmatpush.msrb.mxu2 %v1289_v16  ;;  %924 = vmatpush.msrb.mxu3 %v1276_v13 }
 0x5b4   :  { %905 = vmatpush.msrb.mxu2 %v1297_v18  ;;  %925 = vmatpush.msrb.mxu3 %v1284_v15 }
 0x5b6   :  { %906 = vmatpush.msrb.mxu2 %v1303_v19  ;;  %926 = vmatpush.msrb.mxu3 %v1292_v17  ;;  %v111_v57 = vpop.f32.mrf.mxu0 }
 0x5b7   :  { %v112_v61 = vadd.f32 %v111_v57, %v1372_v28 }
 0x5b8   :  { %v1498_v52 = vpop.f32.mrf.mxu1 }
 0x5be   :  { %v1506_v58 = vpop.f32.mrf.mxu0 }
 0x5c0   :  { %v1500_v53 = vpop.f32.mrf.mxu1 }
 0x5c6   :  { %v1508_v59 = vpop.f32.mrf.mxu0 }
 0x5c8   :  { %v1502_v48 = vpop.f32.mrf.mxu1 }
 0x5ce   :  { %v1510_v60 = vpop.f32.mrf.mxu0 }
 0x62a   :  { %v524_v2 = vpop.f32.mrf.mxu3  ;;  %v504_v11 = vpop.f32.mrf.mxu2 }
 0x62b   :  { %v528_v6 = vadd.f32 %v524_v2, %v150_v1  ;;  %v527_v12 = vadd.f32 %v504_v11, %v109_v10 }
 0x62d   :  { %1097 = vtanh.f32 %v528_v6  ;;  %v1037_v13 = vmul.f32 -1.442695, %v527_v12  ;;  %v1038_v34 = vmul.f32 -1.442695, %v528_v6 }
 0x62f   :  { %1099 = vpow2.f32 %v1037_v13 }
 0x633   :  { %v1098_v7 = vpop.eup %1097 }
 0x634   :  { %570 = vrot.lane.b32.xlu0 %v1098_v7, %s1213_s26 }
 0x635   :  { %v1100_v14 = vpop.eup %1099 }
 0x636   :  { %v535_v15 = vadd.f32 1.0, %v1100_v14 }
 0x638   :  { %1101 = vrcp.f32 %v535_v15  ;;  %v548_v4 = vand.u32 2147483648, %v535_v15  ;;  %vm542_vm14 = vweird.f32 %v535_v15  ;;  %v546_v5 = vand.u32 2147483647, %v535_v15 }
 0x63a   :  { %v549_v20 = vor.u32 1.1754944e-38, %v548_v4  ;;  %vm547_vm0 = vcmp.eq.f32.partialorder %v546_v5, 8.507059e+37 }
 0x63e   :  { %v1102_v16 = vpop.eup %1101 }
 0x63f   :  { %v538_v17 = vmul.f32 %v1102_v16, %v535_v15  ;;  %vm543_vm13 = vweird.f32 %v1102_v16 }
 0x640   :  { %vm544_vm15 = vmor %vm542_vm14, %vm543_vm13 }
 0x641   :  { %v539_v18 = vsub.f32 1.0, %v538_v17 }
 0x643   :  { %v540_v19 = vmul.f32 %v1102_v16, %v539_v18 }
 0x645   :  { %v541_v3 = vadd.f32 %v1102_v16, %v540_v19 }
 0x647   :  { %v545_v8 = vsel %vm544_vm15, %v1102_v16, %v541_v3 }
 0x648   :  { %v550_v23 = vsel %vm547_vm0, %v549_v20, %v545_v8 }
 0x649   :  { %v568_v29 = vmul.f32 %v550_v23, %v1440_v46 }
 0x6a6   :  { %v571_v21 = vpop.permute.xlu0 %570 }
 0x6a7   :  { %v573_v24 = vmul.f32 %v571_v21, %v550_v23 }
 0x6a9   :  { %575 = vrot.lane.b32.xlu1 %v573_v24, %s1213_s26 }
 0x71b   :  { %v576_v30 = vpop.permute.xlu1 %575 }
 0x71c   :  { %v1490_v32 = vadd.f32 %v576_v30, %v568_v29 }
 0x71e   :  { %1103 = vtanh.f32 %v1490_v32 }
 0x71f   :  { %1105 = vpow2.f32 %v1038_v34 }
 0x724   :  { %v1104_v33 = vpop.eup %1103 }
 0x725   :  { %581 = vrot.lane.b32.xlu2 %v1104_v33, %s1213_s26  ;;  %v1106_v35 = vpop.eup %1105 }
 0x726   :  { %v536_v36 = vadd.f32 1.0, %v1106_v35 }
 0x728   :  { %1107 = vrcp.f32 %v536_v36  ;;  %v563_v42 = vand.u32 2147483648, %v536_v36  ;;  %vm557_vm3 = vweird.f32 %v536_v36  ;;  %v561_v43 = vand.u32 2147483647, %v536_v36 }
 0x72a   :  { %v564_v45 = vor.u32 1.1754944e-38, %v563_v42  ;;  %vm562_vm1 = vcmp.eq.f32.partialorder %v561_v43, 8.507059e+37 }
 0x72e   :  { %v1108_v37 = vpop.eup %1107 }
 0x72f   :  { %v553_v38 = vmul.f32 %v1108_v37, %v536_v36  ;;  %vm558_vm2 = vweird.f32 %v1108_v37  ;;  %v156_v36 = vadd.f32 %v1498_v52, %v1368_v22 }
 0x730   :  { %vm559_vm4 = vmor %vm557_vm3, %vm558_vm2 }
 0x731   :  { %v554_v39 = vsub.f32 1.0, %v553_v38 }
 0x733   :  { %v555_v40 = vmul.f32 %v1108_v37, %v554_v39 }
 0x735   :  { %v556_v41 = vadd.f32 %v1108_v37, %v555_v40 }
 0x737   :  { %v560_v44 = vsel %vm559_vm4, %v1108_v37, %v556_v41  ;;  %v115_v41 = vadd.f32 %v1506_v58, %v1372_v28 }
 0x738   :  { %v565_v46 = vsel %vm562_vm1, %v564_v45, %v560_v44 }
 0x77f   :  { %v582_v47 = vpop.permute.xlu2 %581 }
 0x780   :  { %v584_v49 = vmul.f32 %v582_v47, %v565_v46 }
 0x782   :  { %1039 = vmatmul.msk.f32.vlgmr.msrb.gmra.mxu0 %vm180_vm10, %v584_v49  ;;  %1040 = vmatmul.msk.f32.vlgmr.msrb.gmra.mxu1 %vm180_vm10, %v584_v49 }
 0x7ff   :  { %v625_v50 = vpop.f32.mrf.mxu1  ;;  %v605_v62 = vpop.f32.mrf.mxu0 }
 0x800   :  { %v629_v55 = vadd.f32 %v625_v50, %v153_v54  ;;  %v628_v63 = vadd.f32 %v605_v62, %v112_v61 }
 0x802   :  { %1109 = vtanh.f32 %v629_v55  ;;  %v1041_v0 = vmul.f32 -1.442695, %v628_v63  ;;  %v1042_v8 = vmul.f32 -1.442695, %v629_v55 }
 0x804   :  { %1111 = vpow2.f32 %v1041_v0 }
 0x808   :  { %v1110_v56 = vpop.eup %1109 }
 0x809   :  { %671 = vrot.lane.b32.xlu0 %v1110_v56, %s1213_s26 }
 0x80a   :  { %v1112_v1 = vpop.eup %1111 }
 0x80b   :  { %v636_v2 = vadd.f32 1.0, %v1112_v1 }
 0x80d   :  { %1113 = vrcp.f32 %v636_v2  ;;  %v649_v12 = vand.u32 2147483648, %v636_v2  ;;  %vm643_vm6 = vweird.f32 %v636_v2  ;;  %v647_v13 = vand.u32 2147483647, %v636_v2 }
 0x80f   :  { %v650_v15 = vor.u32 1.1754944e-38, %v649_v12  ;;  %vm648_vm8 = vcmp.eq.f32.partialorder %v647_v13, 8.507059e+37 }
 0x813   :  { %v1114_v6 = vpop.eup %1113 }
 0x814   :  { %v639_v7 = vmul.f32 %v1114_v6, %v636_v2  ;;  %vm644_vm5 = vweird.f32 %v1114_v6 }
 0x815   :  { %vm645_vm7 = vmor %vm643_vm6, %vm644_vm5 }
 0x816   :  { %v640_v9 = vsub.f32 1.0, %v639_v7 }
 0x818   :  { %v641_v10 = vmul.f32 %v1114_v6, %v640_v9 }
 0x81a   :  { %v642_v11 = vadd.f32 %v1114_v6, %v641_v10 }
 0x81c   :  { %v646_v14 = vsel %vm645_vm7, %v1114_v6, %v642_v11 }
 0x81d   :  { %v651_v17 = vsel %vm648_vm8, %v650_v15, %v646_v14 }
 0x81e   :  { %v669_v19 = vmul.f32 %v651_v17, %v1490_v32 }
 0x87b   :  { %v672_v16 = vpop.permute.xlu0 %671 }
 0x87c   :  { %v674_v18 = vmul.f32 %v672_v16, %v651_v17 }
 0x87e   :  { %676 = vrot.lane.b32.xlu1 %v674_v18, %s1213_s26 }
 0x8f0   :  { %v677_v3 = vpop.permute.xlu1 %676 }
 0x8f1   :  { %v679_v4 = vadd.f32 %v677_v3, %v669_v19 }
 0x8f3   :  { %1115 = vtanh.f32 %v679_v4 }
 0x8f4   :  { %1117 = vpow2.f32 %v1042_v8 }
 0x8f9   :  { %v1116_v5 = vpop.eup %1115 }
 0x8fa   :  { %682 = vrot.lane.b32.xlu2 %v1116_v5, %s1213_s26  ;;  %v1118_v20 = vpop.eup %1117 }
 0x8fb   :  { %v637_v21 = vadd.f32 1.0, %v1118_v20 }
 0x8fd   :  { %1119 = vrcp.f32 %v637_v21  ;;  %v664_v29 = vand.u32 2147483648, %v637_v21  ;;  %vm658_vm11 = vweird.f32 %v637_v21  ;;  %v662_v30 = vand.u32 2147483647, %v637_v21 }
 0x8ff   :  { %v665_v32 = vor.u32 1.1754944e-38, %v664_v29  ;;  %vm663_vm13 = vcmp.eq.f32.partialorder %v662_v30, 8.507059e+37 }
 0x903   :  { %v1120_v23 = vpop.eup %1119 }
 0x904   :  { %v654_v24 = vmul.f32 %v1120_v23, %v637_v21  ;;  %vm659_vm9 = vweird.f32 %v1120_v23 }
 0x905   :  { %vm660_vm12 = vmor %vm658_vm11, %vm659_vm9 }
 0x906   :  { %v655_v25 = vsub.f32 1.0, %v654_v24 }
 0x908   :  { %v656_v26 = vmul.f32 %v1120_v23, %v655_v25 }
 0x90a   :  { %v657_v27 = vadd.f32 %v1120_v23, %v656_v26 }
 0x90c   :  { %v661_v31 = vsel %vm660_vm12, %v1120_v23, %v657_v27  ;;  %v118_v23 = vadd.f32 %v1508_v59, %v1372_v28 }
 0x90d   :  { %v666_v33 = vsel %vm663_vm13, %v665_v32, %v661_v31 }
 0x954   :  { %v683_v34 = vpop.permute.xlu2 %682 }
 0x955   :  { %v685_v35 = vmul.f32 %v683_v34, %v666_v33 }
 0x957   :  { %1043 = vmatmul.msk.f32.vlgmr.msra.gmra.mxu2 %vm180_vm10, %v685_v35  ;;  %1044 = vmatmul.msk.f32.vlgmr.msra.gmra.mxu3 %vm180_vm10, %v685_v35 }
 0x9da   :  { %v726_v37 = vpop.f32.mrf.mxu3  ;;  %v706_v40 = vpop.f32.mrf.mxu2 }
 0x9db   :  { %v730_v38 = vadd.f32 %v726_v37, %v156_v36  ;;  %v729_v42 = vadd.f32 %v706_v40, %v115_v41 }
 0x9dd   :  { %1121 = vtanh.f32 %v730_v38  ;;  %v1045_v43 = vmul.f32 -1.442695, %v729_v42  ;;  %v1046_v2 = vmul.f32 -1.442695, %v730_v38 }
 0x9df   :  { %1123 = vpow2.f32 %v1045_v43 }
 0x9e3   :  { %v1122_v39 = vpop.eup %1121 }
 0x9e4   :  { %772 = vrot.lane.b32.xlu0 %v1122_v39, %s1213_s26 }
 0x9e5   :  { %v1124_v44 = vpop.eup %1123 }
 0x9e6   :  { %v737_v45 = vadd.f32 1.0, %v1124_v44 }
 0x9e8   :  { %1125 = vrcp.f32 %v737_v45  ;;  %v750_v54 = vand.u32 2147483648, %v737_v45  ;;  %vm744_vm15 = vweird.f32 %v737_v45  ;;  %v748_v50 = vand.u32 2147483647, %v737_v45 }
 0x9ea   :  { %v751_v56 = vor.u32 1.1754944e-38, %v750_v54  ;;  %vm749_vm2 = vcmp.eq.f32.partialorder %v748_v50, 8.507059e+37 }
 0x9ee   :  { %v1126_v46 = vpop.eup %1125 }
 0x9ef   :  { %v740_v47 = vmul.f32 %v1126_v46, %v737_v45  ;;  %vm745_vm14 = vweird.f32 %v1126_v46 }
 0x9f0   :  { %vm746_vm0 = vmor %vm744_vm15, %vm745_vm14 }
 0x9f1   :  { %v741_v49 = vsub.f32 1.0, %v740_v47 }
 0x9f3   :  { %v742_v51 = vmul.f32 %v1126_v46, %v741_v49 }
 0x9f5   :  { %v743_v52 = vadd.f32 %v1126_v46, %v742_v51 }
 0x9f7   :  { %v747_v55 = vsel %vm746_vm0, %v1126_v46, %v743_v52 }
 0x9f8   :  { %v752_v58 = vsel %vm749_vm2, %v751_v56, %v747_v55 }
 0x9f9   :  { %v770_v62 = vmul.f32 %v752_v58, %v679_v4  ;;  %v159_v4 = vadd.f32 %v1500_v53, %v1368_v22 }
 0xa56   :  { %v773_v57 = vpop.permute.xlu0 %772 }
 0xa57   :  { %v775_v61 = vmul.f32 %v773_v57, %v752_v58 }
 0xa59   :  { %777 = vrot.lane.b32.xlu1 %v775_v61, %s1213_s26 }
 0xacb   :  { %v778_v63 = vpop.permute.xlu1 %777 }
 0xacc   :  { %v780_v0 = vadd.f32 %v778_v63, %v770_v62  ;;  %v162_v62 = vadd.f32 %v1502_v48, %v1368_v22 }
 0xace   :  { %1127 = vtanh.f32 %v780_v0 }
 0xacf   :  { %1129 = vpow2.f32 %v1046_v2 }
 0xad4   :  { %v1128_v1 = vpop.eup %1127 }
 0xad5   :  { %783 = vrot.lane.b32.xlu2 %v1128_v1, %s1213_s26  ;;  %v1130_v6 = vpop.eup %1129 }
 0xad6   :  { %v738_v7 = vadd.f32 1.0, %v1130_v6  ;;  %v121_v6 = vadd.f32 %v1510_v60, %v1372_v28 }
 0xad8   :  { %1131 = vrcp.f32 %v738_v7  ;;  %v765_v14 = vand.u32 2147483648, %v738_v7  ;;  %vm759_vm4 = vweird.f32 %v738_v7  ;;  %v763_v15 = vand.u32 2147483647, %v738_v7 }
 0xada   :  { %v766_v17 = vor.u32 1.1754944e-38, %v765_v14  ;;  %vm764_vm5 = vcmp.eq.f32.partialorder %v763_v15, 8.507059e+37 }
 0xade   :  { %v1132_v9 = vpop.eup %1131 }
 0xadf   :  { %v755_v10 = vmul.f32 %v1132_v9, %v738_v7  ;;  %vm760_vm3 = vweird.f32 %v1132_v9 }
 0xae0   :  { %vm761_vm1 = vmor %vm759_vm4, %vm760_vm3 }
 0xae1   :  { %v756_v11 = vsub.f32 1.0, %v755_v10 }
 0xae3   :  { %v757_v12 = vmul.f32 %v1132_v9, %v756_v11 }
 0xae5   :  { %v758_v13 = vadd.f32 %v1132_v9, %v757_v12 }
 0xae7   :  { %v762_v16 = vsel %vm761_vm1, %v1132_v9, %v758_v13 }
 0xae8   :  { %v767_v18 = vsel %vm764_vm5, %v766_v17, %v762_v16 }
 0xb2f   :  { %v784_v19 = vpop.permute.xlu2 %783 }
 0xb30   :  { %v786_v3 = vmul.f32 %v784_v19, %v767_v18 }
 0xb32   :  { %1047 = vmatmul.msk.f32.vlgmr.msra.gmra.mxu0 %vm180_vm10, %v786_v3  ;;  %1048 = vmatmul.msk.f32.vlgmr.msra.gmra.mxu1 %vm180_vm10, %v786_v3 }
 0xbaf   :  { %v827_v5 = vpop.f32.mrf.mxu1  ;;  %v807_v21 = vpop.f32.mrf.mxu0 }
 0xbb0   :  { %v831_v8 = vadd.f32 %v827_v5, %v159_v4  ;;  %v830_v24 = vadd.f32 %v807_v21, %v118_v23 }
 0xbb2   :  { %1133 = vtanh.f32 %v831_v8  ;;  %v1049_v25 = vmul.f32 -1.442695, %v830_v24  ;;  %v1050_v43 = vmul.f32 -1.442695, %v831_v8 }
 0xbb4   :  { %1135 = vpow2.f32 %v1049_v25 }
 0xbb8   :  { %v1134_v20 = vpop.eup %1133 }
 0xbb9   :  { %873 = vrot.lane.b32.xlu0 %v1134_v20, %s1213_s26 }
 0xbba   :  { %v1136_v26 = vpop.eup %1135 }
 0xbbb   :  { %v838_v27 = vadd.f32 1.0, %v1136_v26 }
 0xbbd   :  { %1137 = vrcp.f32 %v838_v27  ;;  %v851_v33 = vand.u32 2147483648, %v838_v27  ;;  %vm845_vm7 = vweird.f32 %v838_v27  ;;  %v849_v34 = vand.u32 2147483647, %v838_v27 }
 0xbbf   :  { %v852_v36 = vor.u32 1.1754944e-38, %v851_v33  ;;  %vm850_vm9 = vcmp.eq.f32.partialorder %v849_v34, 8.507059e+37 }
 0xbc3   :  { %v1138_v29 = vpop.eup %1137 }
 0xbc4   :  { %v841_v30 = vmul.f32 %v1138_v29, %v838_v27  ;;  %vm846_vm6 = vweird.f32 %v1138_v29 }
 0xbc5   :  { %vm847_vm8 = vmor %vm845_vm7, %vm846_vm6 }
 0xbc6   :  { %v842_v31 = vsub.f32 1.0, %v841_v30 }
 0xbc8   :  { %v843_v53 = vmul.f32 %v1138_v29, %v842_v31 }
 0xbca   :  { %v844_v32 = vadd.f32 %v1138_v29, %v843_v53 }
 0xbcc   :  { %v848_v35 = vsel %vm847_vm8, %v1138_v29, %v844_v32 }
 0xbcd   :  { %v853_v37 = vsel %vm850_vm9, %v852_v36, %v848_v35 }
 0xbce   :  { %v871_v39 = vmul.f32 %v853_v37, %v780_v0 }
 0xc2b   :  { %v874_v59 = vpop.permute.xlu0 %873 }
 0xc2c   :  { %v876_v38 = vmul.f32 %v874_v59, %v853_v37 }
 0xc2e   :  { %878 = vrot.lane.b32.xlu1 %v876_v38, %s1213_s26 }
 0xca0   :  { %v879_v40 = vpop.permute.xlu1 %878 }
 0xca1   :  { %v881_v41 = vadd.f32 %v879_v40, %v871_v39 }
 0xca3   :  { %1139 = vtanh.f32 %v881_v41 }
 0xca4   :  { %1141 = vpow2.f32 %v1050_v43 }
 0xca9   :  { %v1140_v42 = vpop.eup %1139 }
 0xcaa   :  { %884 = vrot.lane.b32.xlu2 %v1140_v42, %s1213_s26  ;;  %v1142_v44 = vpop.eup %1141 }
 0xcab   :  { %v839_v45 = vadd.f32 1.0, %v1142_v44 }
 0xcad   :  { %1143 = vrcp.f32 %v839_v45  ;;  %v866_v54 = vand.u32 2147483648, %v839_v45  ;;  %vm860_vm12 = vweird.f32 %v839_v45  ;;  %v864_v50 = vand.u32 2147483647, %v839_v45 }
 0xcaf   :  { %v867_v56 = vor.u32 1.1754944e-38, %v866_v54  ;;  %vm865_vm14 = vcmp.eq.f32.partialorder %v864_v50, 8.507059e+37 }
 0xcb3   :  { %v1144_v46 = vpop.eup %1143 }
 0xcb4   :  { %v856_v47 = vmul.f32 %v1144_v46, %v839_v45  ;;  %vm861_vm11 = vweird.f32 %v1144_v46 }
 0xcb5   :  { %vm862_vm13 = vmor %vm860_vm12, %vm861_vm11 }
 0xcb6   :  { %v857_v49 = vsub.f32 1.0, %v856_v47 }
 0xcb8   :  { %v858_v51 = vmul.f32 %v1144_v46, %v857_v49 }
 0xcba   :  { %v859_v52 = vadd.f32 %v1144_v46, %v858_v51 }
 0xcbc   :  { %v863_v55 = vsel %vm862_vm13, %v1144_v46, %v859_v52 }
 0xcbd   :  { %v868_v57 = vsel %vm865_vm14, %v867_v56, %v863_v55 }
 0xd04   :  { %v885_v58 = vpop.permute.xlu2 %884 }
 0xd05   :  { %v887_v61 = vmul.f32 %v885_v58, %v868_v57 }
 0xd07   :  { %1051 = vmatmul.msk.f32.vlgmr.msrb.gmra.mxu2 %vm180_vm10, %v887_v61  ;;  %1052 = vmatmul.msk.f32.vlgmr.msrb.gmra.mxu3 %vm180_vm10, %v887_v61 }
 0xd8a   :  { %v928_v63 = vpop.f32.mrf.mxu3  ;;  %v908_v2 = vpop.f32.mrf.mxu2 }
 0xd8b   :  { %v932_v0 = vadd.f32 %v928_v63, %v162_v62  ;;  %v931_v7 = vadd.f32 %v908_v2, %v121_v6 }
 0xd8d   :  { %1145 = vtanh.f32 %v932_v0  ;;  %v1053_v9 = vmul.f32 -1.442695, %v931_v7  ;;  %v1054_v20 = vmul.f32 -1.442695, %v932_v0 }
 0xd8f   :  { %1147 = vpow2.f32 %v1053_v9 }
 0xd93   :  { %v1146_v1 = vpop.eup %1145 }
 0xd94   :  { %974 = vrot.lane.b32.xlu0 %v1146_v1, %s1213_s26 }
 0xd95   :  { %v1148_v10 = vpop.eup %1147 }
 0xd96   :  { %v939_v11 = vadd.f32 1.0, %v1148_v10 }
 0xd98   :  { %1149 = vrcp.f32 %v939_v11  ;;  %v952_v15 = vand.u32 2147483648, %v939_v11  ;;  %vm946_vm0 = vweird.f32 %v939_v11  ;;  %v950_v16 = vand.u32 2147483647, %v939_v11 }
 0xd9a   :  { %v953_v18 = vor.u32 1.1754944e-38, %v952_v15  ;;  %vm951_vm3 = vcmp.eq.f32.partialorder %v950_v16, 8.507059e+37 }
 0xd9e   :  { %v1150_v12 = vpop.eup %1149 }
 0xd9f   :  { %v942_v13 = vmul.f32 %v1150_v12, %v939_v11  ;;  %vm947_vm15 = vweird.f32 %v1150_v12 }
 0xda0   :  { %vm948_vm2 = vmor %vm946_vm0, %vm947_vm15 }
 0xda1   :  { %v943_v14 = vsub.f32 1.0, %v942_v13 }
 0xda3   :  { %v944_v22 = vmul.f32 %v1150_v12, %v943_v14 }
 0xda5   :  { %v945_v48 = vadd.f32 %v1150_v12, %v944_v22 }
 0xda7   :  { %v949_v17 = vsel %vm948_vm2, %v1150_v12, %v945_v48 }
 0xda8   :  { %v954_v60 = vsel %vm951_vm3, %v953_v18, %v949_v17 }
 0xda9   :  { %v972_v3 = vmul.f32 %v954_v60, %v881_v41 }
 0xe06   :  { %v975_v28 = vpop.permute.xlu0 %974 }
 0xe07   :  { %v977_v19 = vmul.f32 %v975_v28, %v954_v60 }
 0xe09   :  { %979 = vrot.lane.b32.xlu1 %v977_v19, %s1213_s26 }
 0xe7b   :  { %v980_v4 = vpop.permute.xlu1 %979 }
 0xe7c   :  { %v982_v5 = vadd.f32 %v980_v4, %v972_v3 }
 0xe7e   :  { %1151 = vtanh.f32 %v982_v5 }
 0xe7f   :  { %1153 = vpow2.f32 %v1054_v20 }
 0xe84   :  { %v1152_v8 = vpop.eup %1151 }
 0xe85   :  { %985 = vrot.lane.b32.xlu2 %v1152_v8, %s1213_s26  ;;  %v1154_v21 = vpop.eup %1153 }
 0xe86   :  { %v940_v23 = vadd.f32 1.0, %v1154_v21 }
 0xe88   :  { %1155 = vrcp.f32 %v940_v23  ;;  %v967_v30 = vand.u32 2147483648, %v940_v23  ;;  %vm961_vm1 = vweird.f32 %v940_v23  ;;  %v965_v31 = vand.u32 2147483647, %v940_v23 }
 0xe8a   :  { %v968_v32 = vor.u32 1.1754944e-38, %v967_v30  ;;  %vm966_vm6 = vcmp.eq.f32.partialorder %v965_v31, 8.507059e+37 }
 0xe8e   :  { %v1156_v24 = vpop.eup %1155 }
 0xe8f   :  { %v957_v25 = vmul.f32 %v1156_v24, %v940_v23  ;;  %vm962_vm4 = vweird.f32 %v1156_v24 }
 0xe90   :  { %vm963_vm5 = vmor %vm961_vm1, %vm962_vm4 }
 0xe91   :  { %v958_v26 = vsub.f32 1.0, %v957_v25 }
 0xe93   :  { %v959_v27 = vmul.f32 %v1156_v24, %v958_v26 }
 0xe95   :  { %v960_v29 = vadd.f32 %v1156_v24, %v959_v27 }
 0xe97   :  { %v964_v53 = vsel %vm963_vm5, %v1156_v24, %v960_v29 }
 0xe98   :  { %v969_v33 = vsel %vm966_vm6, %v968_v32, %v964_v53 }
 0xedf   :  { %v986_v34 = vpop.permute.xlu2 %985 }
 0xee0   :  { %v988_v35 = vmul.f32 %v986_v34, %v969_v33 }
 0xee2   :  { %989 = vst.msk [vmem:[#allocation5] sm:$0xff] %vm180_vm10, %v988_v35 }
 0xee3   :  { %1000 = dma.vmem_to_hbm [thread:$0]  %s996_s14, 128, %s998_s17, [#allocation4]  }
 0xee4   :  { %1207 = dma.done.wait [#allocation4], 128  }
 0xee5   :  { %1208 = vsyncadd [#allocation4], 4294967168 }
 0xee6   :  { %1005 = vsyncpa [#allocation3], 1 }
 0xee7   :  { %1006 = vsyncpa [#allocation4], 1 }

</bundles_post_ra>
